<compile_context>
chip_gen: v7x
topology: tpu7x:2x2x1
jax: 0.10.0
libtpu: 0.0.40
codegen_flags: <defaults>
</compile_context>

<pallas_src>
import functools

import jax
import jax.numpy as jnp
from jax import lax
from jax.experimental import pallas as pl
from jax.experimental.pallas import tpu as pltpu


# ----------------------------------------------------------------------------
# Activation map (mirrors act_map in the PyTorch reference).
# ----------------------------------------------------------------------------
def act_map(act):
    if act == "linear":
        return lambda x: x
    elif act == "elu":
        return jax.nn.elu
    elif act == "sigmoid":
        return jax.nn.sigmoid
    elif act == "tanh":
        return jnp.tanh
    elif act == "relu":
        return jax.nn.relu
    elif act == "relu6":
        return jax.nn.relu6
    elif act == "softplus":
        return jax.nn.softplus
    elif act == "leaky_relu":
        return jax.nn.leaky_relu
    else:
        raise Exception("wrong activate function")


# ----------------------------------------------------------------------------
# GCN-style normalised adjacency from edge_index (plain JAX preprocessing).
# ----------------------------------------------------------------------------
def gcn_norm_adj(edge_index, num_nodes, dtype=jnp.float32):
    src, dst = edge_index[0], edge_index[1]
    a = jnp.zeros((num_nodes, num_nodes), dtype=jnp.float32)
    a = a.at[dst, src].set(1.0)
    a = a + jnp.eye(num_nodes, dtype=jnp.float32)      # add self loops
    deg = a.sum(axis=1)
    d_inv_sqrt = jnp.where(deg > 0, lax.rsqrt(deg), 0.0)
    a = a * d_inv_sqrt[:, None] * d_inv_sqrt[None, :]
    return a.astype(dtype)


# ----------------------------------------------------------------------------
# Fused Pallas kernel:  out = act( (A @ X) @ W + b  [ + X_rows @ Wl + bl ] )
# ----------------------------------------------------------------------------
def _na_gcn_kernel(a_ref, x_ref, w_ref, b_ref, *rest, act_fn, with_linear, tm):
    if with_linear:
        wl_ref, bl_ref, o_ref = rest
    else:
        (o_ref,) = rest

    # Aggregation: (tm, Np) @ (Np, Fin) -> (tm, Fin) on the MXU.
    agg = jnp.dot(a_ref[...], x_ref[...], preferred_element_type=jnp.float32)
    # Feature transform: (tm, Fin) @ (Fin, Fout) -> (tm, Fout).
    h = jnp.dot(agg.astype(x_ref.dtype), w_ref[...],
                preferred_element_type=jnp.float32)
    h = h + b_ref[...].astype(jnp.float32)

    if with_linear:
        row0 = pl.multiple_of(pl.program_id(0) * tm, 8)
        x_tile = x_ref[pl.ds(row0, tm), :]              # same rows as this block
        h = h + jnp.dot(x_tile, wl_ref[...], preferred_element_type=jnp.float32)
        h = h + bl_ref[...].astype(jnp.float32)

    o_ref[...] = act_fn(h).astype(o_ref.dtype)


def _sublane_pack(dtype):
    # sublane packing: f32 -> 8, bf16/f16 -> 16, int8/fp8 -> 32
    return {4: 8, 2: 16, 1: 32}.get(jnp.dtype(dtype).itemsize, 8)


def _choose_tile_rows(n, dtype, max_rows=512):
    pack = _sublane_pack(dtype)
    tm = min(max_rows, max(n, pack))
    tm = ((tm + pack - 1) // pack) * pack
    # prefer >= 2 grid steps (megacore sharding on v7x) when the node count allows
    if tm >= n and n > pack:
        half = (n + 1) // 2
        tm = max(pack, ((half + pack - 1) // pack) * pack)
    return tm


def na_op(x, edge_index, w, b, *, w_lin=None, b_lin=None,
          primitive="gcn", act="relu", with_linear=False, max_tile_rows=512):
    """Pallas implementation of NaOp(primitive, in_dim, out_dim, act, with_linear)(x, edge_index)."""
    if primitive != "gcn":
        # TODO(synk): only the 'gcn' NA_OPS primitive is implemented in Pallas.
        raise NotImplementedError(f"primitive {primitive!r} not implemented")
    if with_linear and (w_lin is None or b_lin is None):
        raise ValueError("with_linear=True requires w_lin and b_lin")

    n, f_in = x.shape
    f_out = w.shape[1]
    act_fn = act_map(act)

    a_norm = gcn_norm_adj(edge_index, n, dtype=x.dtype)

    tm = _choose_tile_rows(n, x.dtype, max_tile_rows)
    n_pad = pl.cdiv(n, tm) * tm
    if n_pad != n:
        a_norm = jnp.pad(a_norm, ((0, n_pad - n), (0, n_pad - n)))
        x_p = jnp.pad(x, ((0, n_pad - n), (0, 0)))
    else:
        x_p = x

    b2 = b.reshape(1, f_out)
    operands = [a_norm, x_p, w, b2]
    in_specs = [
        pl.BlockSpec((tm, n_pad), lambda i: (i, 0)),     # adjacency row-tile
        pl.BlockSpec((n_pad, f_in), lambda i: (0, 0)),   # full X, resident
        pl.BlockSpec((f_in, f_out), lambda i: (0, 0)),   # W, resident
        pl.BlockSpec((1, f_out), lambda i: (0, 0)),      # bias
    ]
    if with_linear:
        operands += [w_lin, b_lin.reshape(1, f_out)]
        in_specs += [
            pl.BlockSpec((f_in, f_out), lambda i: (0, 0)),
            pl.BlockSpec((1, f_out), lambda i: (0, 0)),
        ]

    kernel = functools.partial(_na_gcn_kernel, act_fn=act_fn,
                               with_linear=with_linear, tm=tm)

    out = pl.pallas_call(
        kernel,
        out_shape=jax.ShapeDtypeStruct((n_pad, f_out), x.dtype),
        grid_spec=pltpu.PrefetchScalarGridSpec(
            num_scalar_prefetch=0,
            grid=(n_pad // tm,),
            in_specs=in_specs,
            out_specs=pl.BlockSpec((tm, f_out), lambda i: (i, 0)),
        ),
        compiler_params=pltpu.CompilerParams(
            dimension_semantics=("parallel",),
            vmem_limit_bytes=48 * 1024 * 1024,
        ),
    )(*operands)

    return out[:n] if n_pad != n else out


# ----------------------------------------------------------------------------
# Self-test
# ----------------------------------------------------------------------------
if __name__ == "__main__":
    key = jax.random.PRNGKey(0)
    N, F_IN, F_OUT, E = 64, 128, 128, 256
    k1, k2, k3, k4, k5, k6, k7 = jax.random.split(key, 7)

    x = jax.random.normal(k1, (N, F_IN), dtype=jnp.float32)
    src = jax.random.randint(k2, (E,), 0, N)
    dst = jax.random.randint(k3, (E,), 0, N)
    edge_index = jnp.stack([src, dst])

    w = jax.random.normal(k4, (F_IN, F_OUT), dtype=jnp.float32) * 0.05
    b = jax.random.normal(k5, (F_OUT,), dtype=jnp.float32) * 0.05
    w_lin = jax.random.normal(k6, (F_IN, F_OUT), dtype=jnp.float32) * 0.05
    b_lin = jax.random.normal(k7, (F_OUT,), dtype=jnp.float32) * 0.05

    a_norm = gcn_norm_adj(edge_index, N, dtype=jnp.float32)

    # Case 1: with_linear=True, relu
    out1 = jax.block_until_ready(
        na_op(x, edge_index, w, b, w_lin=w_lin, b_lin=b_lin,
              act="relu", with_linear=True))
    ref1 = jax.nn.relu(a_norm @ x @ w + b + x @ w_lin + b_lin)
    assert out1.shape == (N, F_OUT) and out1.dtype == x.dtype
    assert jnp.allclose(out1, ref1, rtol=1e-4, atol=1e-4), "with_linear mismatch"

    # Case 2: with_linear=False, elu
    out2 = jax.block_until_ready(
        na_op(x, edge_index, w, b, act="elu", with_linear=False))
    ref2 = jax.nn.elu(a_norm @ x @ w + b)
    assert out2.shape == (N, F_OUT) and out2.dtype == x.dtype
    assert jnp.allclose(out2, ref2, rtol=1e-4, atol=1e-4), "plain op mismatch"

    print("KERNEL_OK")
</pallas_src>

<mosaic_0001>
module attributes {stable_mosaic.version = 11 : i64} {
  func.func @_na_gcn_kernel(%arg0: i32, %arg1: memref<32x64xf32, #tpu.memory_space<vmem>>, %arg2: memref<64x128xf32, #tpu.memory_space<vmem>>, %arg3: memref<128x128xf32, #tpu.memory_space<vmem>>, %arg4: memref<1x128xf32, #tpu.memory_space<vmem>>, %arg5: memref<128x128xf32, #tpu.memory_space<vmem>>, %arg6: memref<1x128xf32, #tpu.memory_space<vmem>>, %arg7: memref<32x128xf32, #tpu.memory_space<vmem>>) attributes {dimension_semantics = [#tpu.dimension_semantics<parallel>], iteration_bounds = array<i64: 2>, scalar_prefetch = 0 : i64, scratch_operands = 0 : i64, tpu.core_type = #tpu.core_type<tc>, window_params = [{transform_indices = @transform_0, window_bounds = array<i64: 32, 64>}, {pipeline_mode = #tpu.pipeline_mode<synchronous>, transform_indices = @transform_1, window_bounds = array<i64: 64, 128>}, {pipeline_mode = #tpu.pipeline_mode<synchronous>, transform_indices = @transform_2, window_bounds = array<i64: 128, 128>}, {pipeline_mode = #tpu.pipeline_mode<synchronous>, transform_indices = @transform_3, window_bounds = array<i64: 1, 128>}, {pipeline_mode = #tpu.pipeline_mode<synchronous>, transform_indices = @transform_4, window_bounds = array<i64: 128, 128>}, {pipeline_mode = #tpu.pipeline_mode<synchronous>, transform_indices = @transform_5, window_bounds = array<i64: 1, 128>}, {transform_indices = @transform_6, window_bounds = array<i64: 32, 128>}]} {
    %c0 = arith.constant 0 : index
    %c0_0 = arith.constant 0 : index
    %0 = vector.load %arg1[%c0, %c0_0] : memref<32x64xf32, #tpu.memory_space<vmem>>, vector<32x64xf32>
    %c0_1 = arith.constant 0 : index
    %c0_2 = arith.constant 0 : index
    %1 = vector.load %arg2[%c0_1, %c0_2] : memref<64x128xf32, #tpu.memory_space<vmem>>, vector<64x128xf32>
    %cst = arith.constant dense<0.000000e+00> : vector<32x128xf32>
    %2 = tpu.matmul %0, %1, %cst {dimension_numbers = #tpu.dot_dimension_numbers<[1], [0], [0], [1], [0, 0, 1, 1], [], []>} : vector<32x64xf32>, vector<64x128xf32>, vector<32x128xf32> -> vector<32x128xf32>
    %c0_3 = arith.constant 0 : index
    %c0_4 = arith.constant 0 : index
    %3 = vector.load %arg3[%c0_3, %c0_4] : memref<128x128xf32, #tpu.memory_space<vmem>>, vector<128x128xf32>
    %cst_5 = arith.constant dense<0.000000e+00> : vector<32x128xf32>
    %4 = tpu.matmul %2, %3, %cst_5 {dimension_numbers = #tpu.dot_dimension_numbers<[1], [0], [0], [1], [0, 0, 1, 1], [], []>} : vector<32x128xf32>, vector<128x128xf32>, vector<32x128xf32> -> vector<32x128xf32>
    %c0_6 = arith.constant 0 : index
    %c0_7 = arith.constant 0 : index
    %5 = vector.load %arg4[%c0_6, %c0_7] : memref<1x128xf32, #tpu.memory_space<vmem>>, vector<1x128xf32>
    %6 = vector.broadcast %5 : vector<1x128xf32> to vector<32x128xf32>
    %7 = arith.addf %4, %6 : vector<32x128xf32>
    %c32_i32 = arith.constant 32 : i32
    %8 = arith.muli %arg0, %c32_i32 : i32
    %9 = tpu.assume_multiple %8, 8 : i32
    %10 = arith.index_cast %9 : i32 to index
    %c0_8 = arith.constant 0 : index
    %11 = vector.load %arg2[%10, %c0_8] : memref<64x128xf32, #tpu.memory_space<vmem>>, vector<32x128xf32>
    %c0_9 = arith.constant 0 : index
    %c0_10 = arith.constant 0 : index
    %12 = vector.load %arg5[%c0_9, %c0_10] : memref<128x128xf32, #tpu.memory_space<vmem>>, vector<128x128xf32>
    %cst_11 = arith.constant dense<0.000000e+00> : vector<32x128xf32>
    %13 = tpu.matmul %11, %12, %cst_11 {dimension_numbers = #tpu.dot_dimension_numbers<[1], [0], [0], [1], [0, 0, 1, 1], [], []>} : vector<32x128xf32>, vector<128x128xf32>, vector<32x128xf32> -> vector<32x128xf32>
    %14 = arith.addf %7, %13 : vector<32x128xf32>
    %c0_12 = arith.constant 0 : index
    %c0_13 = arith.constant 0 : index
    %15 = vector.load %arg6[%c0_12, %c0_13] : memref<1x128xf32, #tpu.memory_space<vmem>>, vector<1x128xf32>
    %16 = vector.broadcast %15 : vector<1x128xf32> to vector<32x128xf32>
    %17 = arith.addf %14, %16 : vector<32x128xf32>
    %cst_14 = arith.constant 0.000000e+00 : f32
    %18 = vector.broadcast %cst_14 : f32 to vector<32x128xf32>
    %19 = arith.maximumf %17, %18 : vector<32x128xf32>
    %c0_15 = arith.constant 0 : index
    %c0_16 = arith.constant 0 : index
    %20 = vector.load %arg7[%c0_15, %c0_16] : memref<32x128xf32, #tpu.memory_space<vmem>>, vector<32x128xf32>
    tpu.vector_store %arg7[%c0_15, %c0_16], %19 {strides = array<i32>} : memref<32x128xf32, #tpu.memory_space<vmem>>, vector<32x128xf32>,
    return
  }
  func.func @transform_0(%arg0: i32) -> (i32, i32) {
    %c0_i32 = arith.constant 0 : i32
    %c0_i32_0 = arith.constant 0 : i32
    return %arg0, %c0_i32 : i32, i32
  }
  func.func @transform_1(%arg0: i32) -> (i32, i32) {
    %c0_i32 = arith.constant 0 : i32
    %c0_i32_0 = arith.constant 0 : i32
    %c0_i32_1 = arith.constant 0 : i32
    return %c0_i32, %c0_i32_0 : i32, i32
  }
  func.func @transform_2(%arg0: i32) -> (i32, i32) {
    %c0_i32 = arith.constant 0 : i32
    %c0_i32_0 = arith.constant 0 : i32
    %c0_i32_1 = arith.constant 0 : i32
    return %c0_i32, %c0_i32_0 : i32, i32
  }
  func.func @transform_3(%arg0: i32) -> (i32, i32) {
    %c0_i32 = arith.constant 0 : i32
    %c0_i32_0 = arith.constant 0 : i32
    %c0_i32_1 = arith.constant 0 : i32
    return %c0_i32, %c0_i32_0 : i32, i32
  }
  func.func @transform_4(%arg0: i32) -> (i32, i32) {
    %c0_i32 = arith.constant 0 : i32
    %c0_i32_0 = arith.constant 0 : i32
    %c0_i32_1 = arith.constant 0 : i32
    return %c0_i32, %c0_i32_0 : i32, i32
  }
  func.func @transform_5(%arg0: i32) -> (i32, i32) {
    %c0_i32 = arith.constant 0 : i32
    %c0_i32_0 = arith.constant 0 : i32
    %c0_i32_1 = arith.constant 0 : i32
    return %c0_i32, %c0_i32_0 : i32, i32
  }
  func.func @transform_6(%arg0: i32) -> (i32, i32) {
    %c0_i32 = arith.constant 0 : i32
    %c0_i32_0 = arith.constant 0 : i32
    return %arg0, %c0_i32 : i32, i32
  }
}

</mosaic_0001>

<bundles_post_ra>
// kernel: tpu_custom_call.1
= control target key start
LH: loop header
LB: loop body
LE: loop exit
PB: predicated region body
PF: predicated region fallthrough
CT: control target
= control target key end

     0   :  { %11 = vsyncpa [#allocation3], 0  ;;  %s1656_s0 = inlined_call_operand.hbm [shape: f32[64,64], index: 0, kind: input, shape index: {}]   ;;  %s1657_s1 = inlined_call_operand.hbm [shape: f32[64,128], index: 1, kind: input, shape index: {}]   ;;  %s1658_s2 = inlined_call_operand.hbm [shape: f32[128,128], index: 2, kind: input, shape index: {}]   ;;  %s1659_s3 = inlined_call_operand.vmem [shape: f32[1,128], index: 3, kind: input, shape index: {}]   ;;  %s1660_s4 = inlined_call_operand.hbm [shape: f32[128,128], index: 4, kind: input, shape index: {}]   ;;  %s1661_s5 = inlined_call_operand.vmem [shape: f32[1,128], index: 5, kind: input, shape index: {}]   ;;  %s1662_s6 = inlined_call_operand.hbm [shape: f32[64,128], index: 6, kind: output, shape index: {}]  }
   0x1   :  { %13 = vsyncpa [#allocation3 + $0x1], 0 }
   0x2   :  { %14 = vsyncpa [#allocation6], 0 }
   0x3   :  { %15 = vsyncpa [#allocation9], 0 }
   0x4   :  { %16 = vsyncpa [#allocation4], 0 }
   0x5   :  { %18 = vsyncpa [#allocation4 + $0x1], 0  ;;  %s1364_s21 = smov 0   ;;  %s1366_s22 = smov 0  }
   0x6   :  { %s1368_s23 = smov 0   ;;  %s1370_s24 = smov 0  }
   0x7 LB: > { %s1385_s25 = sadd.s32 4294967295, %s1318_s24   ;;  %s782_s26 = sadd.s32 4294967294, %s1318_s24   ;;  %s1318_s24 = sphi %s1370_s24, %s1685_s24   ;;  %s1314_s23 = sphi %s1368_s23, %s1684_s23   ;;  %s1310_s22 = sphi %s1366_s22, %s1683_s22   ;;  %s1306_s21 = sphi %s1364_s21, %s1682_s21  }
   0x8   : > { %p44_p0 = scmp.ne.s32.totalorder %s1310_s22, %s1306_s21  ;;  %p1663_p1 = scmp.eq.s32.totalorder %s1385_s25, 0 }
   0x9   : > { %p179_p3 = scmp.eq.s32.totalorder %s782_s26, 1  ;;  %p783_p5 = scmp.ge.s32.totalorder %s1318_s24, 1 }
   0xa   : > { %p1394_p4 = por %p1663_p1, %p44_p0  ;;  %p186_p7 = scmp.lt.s32.totalorder %s1318_s24, 3 }
   0xb   : > { %p1399_p6 = por %p179_p3, %p44_p0  ;;  %s1320_s30 = smov [#allocation5]  }
   0xc   : > { %s1666_s27 = scalar_select %p1394_p4, 1, 0 }
   0xd   : > { %s1667_s28 = scalar_select %p1399_p6, 1, 0 }
   0xe   : > { %p1404_p8 = pnand %p783_p5, %p186_p7  ;;  %s198_s7 = sshll.u32 %s1320_s30, 4  ;;  %s1408_s7 = int_to_ptr.vmem [resolvable:$true] %s198_s7 }
   0xf   : > { %s1321_s9 = smov [#allocation7]   ;;  %s1322_s11 = smov [#allocation8]  }
  0x10   : > { %s1668_s29 = scalar_select %p1404_p8, 1, 0 }
  0x11   : > { %p1065_p9 = pneg %p1404_p8  ;;  %s211_s10 = sshll.u32 %s1321_s9, 4  ;;  %s1419_s10 = int_to_ptr.vmem [resolvable:$true] %s211_s10 }
  0x12   : > { %s1421_s12 = sshll.u32 %s1322_s11, 4  ;;  %s1130_s15 = scalar_lea.hbm %s1657_s1, 1024  ;;  %s228_s12 = int_to_ptr.vmem [resolvable:$true] %s1421_s12 }
  0x13   : > { %p1415_p11 = pnand %p1065_p9, %p1663_p1  ;;  %p1131_p12 = scmp.ne.s32.totalorder %s1657_s1, %s1130_s15 }
  0x14   : > { %p1137_p5 = scmp.lt.u32.totalorder %s1130_s15, %s1657_s1 }
  0x15   : > { %p1431_p13 = pneg %p1415_p11 }
  0x17   : > { %p1133_p0 = pnand %p1431_p13, %p1131_p12 }
  0x19   : > { %p1134_p3 = pneg %p1133_p0 }
  0x1b   : > { %p1139_p7 = pnand %p1137_p5, %p1134_p3 }
  0x1d   : > { %1142 = shalt.err (!%p1139_p7)
}
  0x1e   : > { %s1143_s26 = scalar_lea.vmem %s1408_s7, 1024  ;;  %p1151_p2 = scmp.lt.s32.totalorder %s1408_s7, %s1408_s7 }
  0x1f   : > { %p1144_p9 = scmp.ne.s32.totalorder %s1408_s7, %s1143_s26  ;;  %p1152_p6 = scmp.lt.s32.totalorder %s1143_s26, %s1143_s26 }
  0x21   : > { %p1146_p10 = pnand %p1144_p9, %p1431_p13  ;;  %p1153_p12 = por %p1152_p6, %p1151_p2 }
  0x23   : > { %p1147_p1 = pneg %p1146_p10 }
  0x25   : > { %p1154_p0 = pnand %p1153_p12, %p1147_p1 }
  0x27   : > { %1157 = shalt.err (!%p1154_p0)
}
  0x28   : > { %s1323_s30 = smov 128   ;;  %s1324_s9 = smov 8  }
  0x29   : > { %1068 = dma.hbm_to_vmem [thread:$0]  (!%p1415_p11), %s1657_s1, 1024, %s1408_s7, [#allocation6], %s1323_s30, %s1323_s30, %s1324_s9  }
  0x2a   : > { %s1158_s16 = scalar_lea.hbm %s1658_s2, 2048 }
  0x2b   : > { %p1159_p1 = scmp.ne.s32.totalorder %s1658_s2, %s1158_s16  ;;  %p1165_p10 = scmp.lt.u32.totalorder %s1158_s16, %s1658_s2 }
  0x2d   : > { %p1161_p2 = pnand %p1159_p1, %p1431_p13 }
  0x2f   : > { %p1162_p6 = pneg %p1161_p2 }
  0x31   : > { %p1167_p3 = pnand %p1165_p10, %p1162_p6 }
  0x33   : > { %1170 = shalt.err (!%p1167_p3)
}
  0x34   : > { %s1171_s7 = scalar_lea.vmem %s1419_s10, 2048  ;;  %p1179_p12 = scmp.lt.s32.totalorder %s1419_s10, %s1419_s10 }
  0x35   : > { %p1172_p5 = scmp.ne.s32.totalorder %s1419_s10, %s1171_s7  ;;  %p1180_p0 = scmp.lt.s32.totalorder %s1171_s7, %s1171_s7 }
  0x37   : > { %p1174_p7 = pnand %p1172_p5, %p1431_p13  ;;  %p1181_p1 = por %p1180_p0, %p1179_p12 }
  0x39   : > { %p1175_p9 = pneg %p1174_p7 }
  0x3b   : > { %p1182_p2 = pnand %p1181_p1, %p1175_p9 }
  0x3d   : > { %1185 = shalt.err (!%p1182_p2)
}
  0x3e   : > { %1071 = dma.hbm_to_vmem [thread:$0]  (!%p1415_p11), %s1658_s2, 2048, %s1419_s10, [#allocation6], %s1323_s30, %s1323_s30, %s1324_s9  }
  0x3f   : > { %s1186_s16 = scalar_lea.hbm %s1660_s4, 2048 }
  0x40   : > { %p1187_p6 = scmp.ne.s32.totalorder %s1660_s4, %s1186_s16  ;;  %p1193_p5 = scmp.lt.u32.totalorder %s1186_s16, %s1660_s4 }
  0x42   : > { %p1189_p10 = pnand %p1187_p6, %p1431_p13 }
  0x44   : > { %p1190_p3 = pneg %p1189_p10 }
  0x46   : > { %p1195_p7 = pnand %p1193_p5, %p1190_p3 }
  0x48   : > { %1198 = shalt.err (!%p1195_p7)
}
  0x49   : > { %s1199_s7 = scalar_lea.vmem %s228_s12, 2048  ;;  %p1207_p1 = scmp.lt.s32.totalorder %s228_s12, %s228_s12 }
  0x4a   : > { %p1200_p9 = scmp.ne.s32.totalorder %s228_s12, %s1199_s7  ;;  %p1208_p2 = scmp.lt.s32.totalorder %s1199_s7, %s1199_s7 }
  0x4c   : > { %p1202_p12 = pnand %p1200_p9, %p1431_p13  ;;  %p1209_p4 = por %p1208_p2, %p1207_p1 }
  0x4e   : > { %p1203_p0 = pneg %p1202_p12 }
  0x50   : > { %p1210_p8 = pnand %p1209_p4, %p1203_p0 }
  0x52   : > { %1213 = shalt.err (!%p1210_p8)
}
  0x53   : > { %1074 = dma.hbm_to_vmem [thread:$0]  (!%p1415_p11), %s1660_s4, 2048, %s228_s12, [#allocation9], %s1323_s30, %s1323_s30, %s1324_s9  }
  0x54   : > { %s1504_s18 = sadd.s32 1, %s1318_s24   ;;  %s31_s13 = sadd.s32 1, %s1314_s23 }
  0x55   : > { %s28_s8 = ssub.s32 %s1318_s24, %s1504_s18  ;;  %p38_p8 = scmp.ne.s32.totalorder %s1314_s23, %s1310_s22 }
  0x56   : > { %p29_p4 = scmp.eq.s32.totalorder %s28_s8, 0  ;;  %p39_p13 = scmp.eq.s32.totalorder %s1318_s24, 0 }
  0x57   : > { %p1086_p6 = scmp.lt.s32.totalorder %s1318_s24, 2  ;;  %p1671_p3 = scmp.eq.s32.totalorder %s1385_s25, 1 }
  0x58   : > { %s1514_s14 = scalar_select %p29_p4, %s1314_s23, %s31_s13  }
  0x59   : > { %p40_p10 = por %p39_p13, %p38_p8  ;;  %p1518_p5 = por %p1671_p3, %p38_p8 }
  0x5a   : > { %s244_s16 = sand.u32 1, %s1314_s23   ;;  %s809_s17 = sshll.u32 %s1318_s24, 9 }
  0x5b   : > { %s788_s12 = sshll.u32 %s244_s16, 5  ;;  %s1527_s26 = scalar_lea.hbm %s1656_s0, %s809_s17 }
  0x5c   : > { %s248_s7 = scalar_lea.vmem [#allocation2], %s788_s12  ;;  %p1529_p11 = pnand %p1086_p6, %p40_p10 }
  0x5d   : > { %s255_s10 = sshll.u32 %s248_s7, 4  ;;  %s1535_s8 = scalar_lea.sflag [#allocation3], %s244_s16  ;;  %s1533_s10 = int_to_ptr.vmem [resolvable:$true] %s255_s10 }
  0x5e   : > { %s1214_s13 = scalar_lea.hbm %s1527_s26, 512  ;;  %p1216_p9 = pneg %p1529_p11 }
  0x5f   : > { %p1215_p7 = scmp.ne.s32.totalorder %s1527_s26, %s1214_s13  ;;  %s1219_s19 = scalar_lea.hbm %s1656_s0, 1024 }
  0x60   : > { %p1220_p1 = scmp.lt.u32.totalorder %s1527_s26, %s1656_s0  ;;  %p1221_p2 = scmp.lt.u32.totalorder %s1219_s19, %s1214_s13 }
  0x61   : > { %p1217_p12 = pnand %p1216_p9, %p1215_p7  ;;  %p1223_p8 = scmp.lt.u32.totalorder %s1214_s13, %s1527_s26 }
  0x62   : > { %p1222_p4 = por %p1221_p2, %p1220_p1 }
  0x63   : > { %p1218_p0 = pneg %p1217_p12 }
  0x64   : > { %p1224_p13 = por %p1223_p8, %p1222_p4 }
  0x66   : > { %p1225_p6 = pnand %p1224_p13, %p1218_p0 }
  0x68   : > { %1228 = shalt.err (!%p1225_p6)
}
  0x69   : > { %s1229_s16 = scalar_lea.vmem %s1533_s10, 512  ;;  %s1325_s17 = smov [#allocation2]  }
  0x6a   : > { %p1230_p10 = scmp.ne.s32.totalorder %s1533_s10, %s1229_s16  ;;  %s1234_s12 = sshll.u32 %s1325_s17, 4  ;;  %s1235_s12 = int_to_ptr.vmem [resolvable:$false] %s1234_s12 }
  0x6b   : > { %s1236_s20 = scalar_lea.vmem %s1235_s12, 1024  ;;  %p1237_p12 = scmp.lt.s32.totalorder %s1533_s10, %s1235_s12 }
  0x6c   : > { %p1232_p3 = pnand %p1230_p10, %p1216_p9  ;;  %p1238_p1 = scmp.lt.s32.totalorder %s1236_s20, %s1229_s16 }
  0x6e   : > { %p1233_p7 = pneg %p1232_p3  ;;  %p1239_p2 = por %p1238_p1, %p1237_p12 }
  0x70   : > { %p1240_p4 = pnand %p1239_p2, %p1233_p7 }
  0x72   : > { %1243 = shalt.err (!%p1240_p4)
}
  0x73   : > { %1078 = dma.hbm_to_vmem [thread:$0]  (!%p1529_p11), %s1527_s26, 512, %s1533_s10, %s1535_s8, %s1323_s30, %s1323_s30, %s1324_s9  }
  0x74   : > { %p1674_p9 = scmp.ne.s32.totalorder %s1668_s29, 0 }
  0x75   : > { %s1569_s13 = sand.u32 (!%p1674_p9), 1, %s1310_s22   ;;  %p1675_p0 = scmp.ne.s32.totalorder (!%p1674_p9), %s1666_s27, 0 }
  0x76   : > { %267 = sbr.rel (%p1674_p9) target bundleno = 606 (0x25e), region = 44  ;;  %s792_s19 = sshll.u32 (!%p1674_p9), %s1569_s13, 5 }
  0x77   : > { %s270_s7 = scalar_lea.sflag (!%p1674_p9), [#allocation3], %s1569_s13  ;;  %s1575_s11 = scalar_lea.vmem (!%p1674_p9), [#allocation2], %s792_s19 }
  0x7d   : > { %1289 = dma.done.wait (%p1675_p0), %s270_s7, 512  }
  0x7e   : > { %1291 = vsyncadd (%p1675_p0), %s270_s7, 4294966784  ;;  %p1676_p11 = scmp.eq.s32.totalorder %s1385_s25, 0 }
  0x80   : > { %1293 = dma.done.wait (%p1676_p11), [#allocation6], 3072   ;;  %p1677_p8 = pmov %p1676_p11 }
  0x82   : > { %1295 = vsyncadd (%p1677_p8), [#allocation6], 4294964224  ;;  %p1678_p13 = pmov %p1677_p8 }
  0x83   : > { %p1679_p6 = pmov %p1677_p8 }
  0x84   : > { %1297 = dma.done.wait (%p1678_p13), [#allocation9], 2048  }
  0x85   : > { %1299 = vsyncadd (%p1679_p6), [#allocation9], 4294965248  ;;  %v320_v0 = vld [vmem:[#allocation5] sm:$0xff]  ;;  %v321_v1 = vld [vmem:[#allocation5 + $0x8] sm:$0xff]  ;;  %vm328_vm0 = vcmask 523264   ;;  %s802_s27 = sshll.u32 %s1385_s25, 5 }
  0x86   : > { %v322_v2 = vld [vmem:[#allocation5 + $0x10] sm:$0xff]  ;;  %v961_v3 = vpack.c.bf16 %v321_v1, %v320_v0  ;;  %v323_v4 = vld [vmem:[#allocation5 + $0x18] sm:$0xff]  ;;  %v324_v6 = vld [vmem:[#allocation5 + $0x20] sm:$0xff]  ;;  %s535_s29 = scalar_lea.vmem [#allocation5], %s802_s27  ;;  %s313_s8 = scalar_lea.vmem [#allocation10], %s792_s19 }
  0x87   : > { %v965_v5 = vpack.c.bf16 %v323_v4, %v322_v2  ;;  %v325_v7 = vld [vmem:[#allocation5 + $0x28] sm:$0xff]  ;;  %v316_v8 = vld [vmem:[%s1575_s11] sm:$0xff]  ;;  %v326_v11 = vld [vmem:[#allocation5 + $0x30] sm:$0xff]  ;;  %s678_s16 = sshll.u32 %s313_s8, 4  ;;  %s810_s17 = sshll.u32 %s1385_s25, 9  ;;  %s1607_s16 = int_to_ptr.vmem [resolvable:$true] %s678_s16 }
  0x88   : > { %962 = vmatprep.subr.bf16.mxu0 %v961_v3  ;;  %879 = vmatprep.mubr.msk.f32.mxu0 %vm328_vm0, %v316_v8  ;;  %v540_v9 = vld [vmem:[#allocation8] sm:$0xff]  ;;  %v969_v10 = vpack.c.bf16 %v325_v7, %v324_v6  ;;  %v541_v12 = vld [vmem:[#allocation8 + $0x8] sm:$0xff]  ;;  %v327_v13 = vld [vmem:[#allocation5 + $0x38] sm:$0xff]  ;;  %s1612_s19 = scalar_lea.hbm %s1662_s6, %s810_s17  ;;  %s665_s7 = scalar_lea.sflag [#allocation4], %s1569_s13 }
  0x89   : > { %964 = vmatpush3.bf16.msra.mxu0 %v961_v3  ;;  %v1009_v14 = vpack.c.bf16 %v541_v12, %v540_v9  ;;  %v542_v15 = vld [vmem:[#allocation8 + $0x10] sm:$0xff]  ;;  %v543_v16 = vld [vmem:[#allocation8 + $0x18] sm:$0xff]  ;;  %v544_v18 = vld [vmem:[#allocation8 + $0x20] sm:$0xff]  ;;  %v973_v20 = vpack.c.bf16 %v327_v13, %v326_v11  ;;  %s1244_s25 = scalar_lea.vmem %s1607_s16, 512 }
  0x8a   : > { %966 = vmatprep.subr.bf16.mxu0 %v965_v5  ;;  %v1013_v17 = vpack.c.bf16 %v543_v16, %v542_v15  ;;  %v545_v19 = vld [vmem:[#allocation8 + $0x28] sm:$0xff]  ;;  %v426_v21 = vld [vmem:[#allocation7] sm:$0xff]  ;;  %v546_v24 = vld [vmem:[#allocation8 + $0x30] sm:$0xff]  ;;  %p1245_p10 = scmp.ne.s32.totalorder %s1607_s16, %s1244_s25 }
  0x8b   : > { %1010 = vmatprep.subr.bf16.mxu1 %v1009_v14  ;;  %v427_v22 = vld [vmem:[#allocation7 + $0x8] sm:$0xff]  ;;  %v1017_v23 = vpack.c.bf16 %v545_v19, %v544_v18  ;;  %v547_v25 = vld [vmem:[#allocation8 + $0x38] sm:$0xff]  ;;  %v428_v27 = vld [vmem:[#allocation7 + $0x10] sm:$0xff] }
  0x8c   : > { %1012 = vmatpush3.bf16.msra.mxu1 %v1009_v14  ;;  %v977_v26 = vpack.c.bf16 %v427_v22, %v426_v21  ;;  %v429_v28 = vld [vmem:[#allocation7 + $0x18] sm:$0xff]  ;;  %v1021_v29 = vpack.c.bf16 %v547_v25, %v546_v24  ;;  %v548_v30 = vld [vmem:[#allocation8 + $0x40] sm:$0xff]  ;;  %v549_v31 = vld [vmem:[#allocation8 + $0x48] sm:$0xff]  ;;  %p1246_p3 = pnand %p1245_p10, %p1518_p5 }
  0x8d   : > { %968 = vmatpush3.bf16.msra.mxu0 %v965_v5  ;;  %1014 = vmatprep.subr.bf16.mxu1 %v1013_v17  ;;  %v317_v32 = vld [vmem:[%s1575_s11 + $0x8] sm:$0xff]  ;;  %v318_v33 = vld [vmem:[%s1575_s11 + $0x10] sm:$0xff]  ;;  %v981_v34 = vpack.c.bf16 %v429_v28, %v428_v27  ;;  %v430_v35 = vld [vmem:[#allocation7 + $0x20] sm:$0xff]  ;;  %v1025_v37 = vpack.c.bf16 %v549_v31, %v548_v30 }
  0x8e   : > { %970 = vmatprep.subr.bf16.mxu0 %v969_v10  ;;  %v431_v36 = vld [vmem:[#allocation7 + $0x28] sm:$0xff]  ;;  %v550_v38 = vld [vmem:[#allocation8 + $0x50] sm:$0xff]  ;;  %v551_v39 = vld [vmem:[#allocation8 + $0x58] sm:$0xff]  ;;  %p1247_p7 = pneg %p1246_p3 }
  0x8f   : > { %v319_v40 = vld [vmem:[%s1575_s11 + $0x18] sm:$0xff]  ;;  %v985_v41 = vpack.c.bf16 %v431_v36, %v430_v35  ;;  %v432_v42 = vld [vmem:[#allocation7 + $0x30] sm:$0xff]  ;;  %v1029_v44 = vpack.c.bf16 %v551_v39, %v550_v38  ;;  %v552_v45 = vld [vmem:[#allocation8 + $0x60] sm:$0xff]  ;;  %s1326_s11 = smov [#allocation10]  }
  0x90   : > { %1016 = vmatpush3.bf16.msra.mxu1 %v1013_v17  ;;  %v433_v43 = vld [vmem:[#allocation7 + $0x38] sm:$0xff]  ;;  %v553_v46 = vld [vmem:[#allocation8 + $0x68] sm:$0xff]  ;;  %v434_v48 = vld [vmem:[#allocation7 + $0x40] sm:$0xff]  ;;  %s1248_s27 = sshll.u32 %s1326_s11, 4  ;;  %s1249_s27 = int_to_ptr.vmem [resolvable:$false] %s1248_s27 }
  0x91   : > { %972 = vmatpush3.bf16.msra.mxu0 %v969_v10  ;;  %1018 = vmatprep.subr.bf16.mxu1 %v1017_v23  ;;  %v989_v47 = vpack.c.bf16 %v433_v43, %v432_v42  ;;  %v435_v49 = vld [vmem:[#allocation7 + $0x48] sm:$0xff]  ;;  %v1033_v50 = vpack.c.bf16 %v553_v46, %v552_v45  ;;  %v436_v52 = vld [vmem:[#allocation7 + $0x50] sm:$0xff]  ;;  %v437_v53 = vld [vmem:[#allocation7 + $0x58] sm:$0xff]  ;;  %p1251_p12 = scmp.lt.s32.totalorder %s1607_s16, %s1249_s27 }
  0x92   : > { %974 = vmatprep.subr.bf16.mxu0 %v973_v20  ;;  %v993_v51 = vpack.c.bf16 %v435_v49, %v434_v48  ;;  %v997_v54 = vpack.c.bf16 %v437_v53, %v436_v52  ;;  %v438_v55 = vld [vmem:[#allocation7 + $0x60] sm:$0xff]  ;;  %v439_v56 = vld [vmem:[#allocation7 + $0x68] sm:$0xff]  ;;  %v440_v58 = vld [vmem:[#allocation7 + $0x70] sm:$0xff] }
  0x93   : > { %v1001_v57 = vpack.c.bf16 %v439_v56, %v438_v55  ;;  %v441_v59 = vld [vmem:[#allocation7 + $0x78] sm:$0xff]  ;;  %v554_v61 = vld [vmem:[#allocation8 + $0x70] sm:$0xff]  ;;  %v536_v0 = vld [vmem:[%s535_s29] sm:$0xff] }
  0x94   : > { %1020 = vmatpush3.bf16.msra.mxu1 %v1017_v23  ;;  %v1005_v60 = vpack.c.bf16 %v441_v59, %v440_v58  ;;  %v555_v62 = vld [vmem:[#allocation8 + $0x78] sm:$0xff]  ;;  %955 = vmatprep.mubr.f32.mxu1 %v536_v0  ;;  %v537_v1 = vld [vmem:[%s535_s29 + $0x8] sm:$0xff]  ;;  %v538_v2 = vld [vmem:[%s535_s29 + $0x10] sm:$0xff] }
  0x95   : > { %976 = vmatpush3.bf16.msra.mxu0 %v973_v20  ;;  %1022 = vmatprep.subr.bf16.mxu1 %v1021_v29  ;;  %v1037_v63 = vpack.c.bf16 %v555_v62, %v554_v61  ;;  %v539_v3 = vld [vmem:[%s535_s29 + $0x18] sm:$0xff]  ;;  %v801_v12 = vld [vmem:[%s1659_s3] ss:$0 sm:$0xff]  ;;  %s1250_s29 = scalar_lea.vmem %s1249_s27, 1024 }
  0x96   : > { %978 = vmatprep.subr.bf16.mxu0 %v977_v26  ;;  %v803_v17 = vld [vmem:[%s1661_s5] ss:$0 sm:$0xff]  ;;  %p1252_p1 = scmp.lt.s32.totalorder %s1250_s29, %s1244_s25 }
  0x98   : > { %880 = vmatmul.mubr.msk.f32.vlgmr.msra.gmra.mrb[0].mxu0 %vm328_vm0, %v317_v32  ;;  %1024 = vmatpush3.bf16.msra.mxu1 %v1021_v29  ;;  %p1253_p2 = por %p1252_p1, %p1251_p12 }
  0x99   : > { %882 = vmatprep.mubr.msk.f32.mxu0 %vm328_vm0, %v318_v33  ;;  %980 = vmatpush3.bf16.msra.mxu0 %v977_v26 }
  0x9a   : > { %982 = vmatprep.subr.bf16.mxu0 %v981_v34  ;;  %1026 = vmatprep.subr.bf16.mxu1 %v1025_v37  ;;  %p1254_p4 = pnand %p1253_p2, %p1247_p7 }
  0x9c   : > { %883 = vmatmul.mubr.msk.f32.gmra.mrb[2].mxu0 %vm328_vm0, %v319_v40  ;;  %1028 = vmatpush3.bf16.msra.mxu1 %v1025_v37 }
  0x9d   : > { %984 = vmatpush3.bf16.msra.mxu0 %v981_v34  ;;  %1030 = vmatprep.subr.bf16.mxu1 %v1029_v44 }
  0x9e   : > { %986 = vmatprep.subr.bf16.mxu0 %v985_v41 }
  0xa0   : > { %1032 = vmatpush3.bf16.msra.mxu1 %v1029_v44 }
  0xa1   : > { %988 = vmatpush3.bf16.msra.mxu0 %v985_v41  ;;  %1034 = vmatprep.subr.bf16.mxu1 %v1033_v50 }
  0xa2   : > { %990 = vmatprep.subr.bf16.mxu0 %v989_v47 }
  0xa4   : > { %1036 = vmatpush3.bf16.msra.mxu1 %v1033_v50 }
  0xa5   : > { %992 = vmatpush3.bf16.msra.mxu0 %v989_v47  ;;  %1038 = vmatprep.subr.bf16.mxu1 %v1037_v63 }
  0xa6   : > { %994 = vmatprep.subr.bf16.mxu0 %v993_v51 }
  0xa8   : > { %1040 = vmatpush3.bf16.msra.mxu1 %v1037_v63 }
  0xa9   : > { %996 = vmatpush3.bf16.msra.mxu0 %v993_v51 }
  0xaa   : > { %998 = vmatprep.subr.bf16.mxu0 %v997_v54 }
  0xab   : > { %956 = vmatmul.mubr.f32.vlgmr.msra.gmra.mrb[0].mxu1 %v537_v1 }
  0xac   : > { %958 = vmatprep.mubr.f32.mxu1 %v538_v2 }
  0xad   : > { %1000 = vmatpush3.bf16.msra.mxu0 %v997_v54 }
  0xae   : > { %1002 = vmatprep.subr.bf16.mxu0 %v1001_v57 }
  0xaf   : > { %959 = vmatmul.mubr.f32.gmra.mrb[2].mxu1 %v539_v3 }
  0xb1   : > { %1004 = vmatpush3.bf16.msra.mxu0 %v1001_v57 }
  0xb2   : > { %1006 = vmatprep.subr.bf16.mxu0 %v1005_v60 }
  0xb5   : > { %1008 = vmatpush3.bf16.msra.mxu0 %v1005_v60 }
 0x16b   : > { %v881_v4 = vpop.f32.mrb[0].mxu0 }
 0x16c   : > { %v407_v5 = vpop.f32.mrb[1].mxu0 }
 0x16d   : > { %917 = vmatprep.mubr.f32.mxu0 %v407_v5 }
 0x16e   : > { %918 = vmatmul.mubr.f32.vlgmr.msra.gmra.mrb[4].mxu0 %v881_v4 }
 0x16f   : > { %v884_v6 = vpop.f32.mrb[2].mxu0 }
 0x170   : > { %v417_v7 = vpop.f32.mrb[3].mxu0 }
 0x171   : > { %920 = vmatprep.mubr.f32.mxu0 %v417_v7 }
 0x172   : > { %921 = vmatmul.mubr.f32.gmra.mrb[6].mxu0 %v884_v6 }
 0x17e   : > { %v957_v8 = vpop.f32.mrb[0].mxu1 }
 0x17f   : > { %v622_v9 = vpop.f32.mrb[1].mxu1 }
 0x182   : > { %v960_v10 = vpop.f32.mrb[2].mxu1 }
 0x183   : > { %v632_v11 = vpop.f32.mrb[3].mxu1 }
 0x241   : > { %v919_v13 = vpop.f32.mrb[4].mxu0 }
 0x242   : > { %v521_v14 = vadd.f32 %v919_v13, %v801_v12  ;;  %v515_v15 = vpop.f32.mrb[5].mxu0 }
 0x243   : > { %v516_v16 = vadd.f32 %v801_v12, %v515_v15 }
 0x244   : > { %v642_v18 = vadd.f32 %v957_v8, %v521_v14 }
 0x245   : > { %v641_v19 = vadd.f32 %v622_v9, %v516_v16  ;;  %v922_v20 = vpop.f32.mrb[6].mxu0 }
 0x246   : > { %v653_v21 = vadd.f32 %v803_v17, %v642_v18  ;;  %v531_v22 = vadd.f32 %v922_v20, %v801_v12  ;;  %v525_v23 = vpop.f32.mrb[7].mxu0 }
 0x247   : > { %v652_v24 = vadd.f32 %v803_v17, %v641_v19  ;;  %v526_v25 = vadd.f32 %v801_v12, %v525_v23 }
 0x248   : > { %v657_v26 = vmax.f32 %v653_v21, 0.0  ;;  %v644_v27 = vadd.f32 %v960_v10, %v531_v22 }
 0x249   : > { %v656_v28 = vmax.f32 %v652_v24, 0.0  ;;  %v643_v29 = vadd.f32 %v632_v11, %v526_v25 }
 0x24a   : > { %661 = vst [vmem:[%s313_s8 + $0x8] sm:$0xff] %v657_v26  ;;  %v655_v30 = vadd.f32 %v803_v17, %v644_v27 }
 0x24b   : > { %660 = vst [vmem:[%s313_s8] sm:$0xff] %v656_v28  ;;  %v654_v31 = vadd.f32 %v803_v17, %v643_v29 }
 0x24c   : > { %v659_v32 = vmax.f32 %v655_v30, 0.0 }
 0x24d   : > { %v658_v33 = vmax.f32 %v654_v31, 0.0 }
 0x24e   : > { %663 = vst [vmem:[%s313_s8 + $0x18] sm:$0xff] %v659_v32 }
 0x24f   : > { %662 = vst [vmem:[%s313_s8 + $0x10] sm:$0xff] %v658_v33 }
 0x250   : > { %1257 = shalt.err (!%p1254_p4)
}
 0x251   : > { %s1258_s30 = scalar_lea.hbm %s1612_s19, 512  ;;  %s1262_s10 = scalar_lea.hbm %s1662_s6, 1024 }
 0x252   : > { %p1259_p9 = scmp.ne.s32.totalorder %s1612_s19, %s1258_s30  ;;  %p1263_p8 = scmp.lt.u32.totalorder %s1612_s19, %s1662_s6 }
 0x253   : > { %p1264_p13 = scmp.lt.u32.totalorder %s1262_s10, %s1258_s30  ;;  %p1266_p10 = scmp.lt.u32.totalorder %s1258_s30, %s1612_s19 }
 0x254   : > { %p1260_p0 = pnand %p1259_p9, %p1518_p5 }
 0x255   : > { %p1265_p6 = por %p1264_p13, %p1263_p8 }
 0x256   : > { %p1261_p11 = pneg %p1260_p0 }
 0x257   : > { %p1267_p3 = por %p1266_p10, %p1265_p6 }
 0x259   : > { %p1268_p7 = pnand %p1267_p3, %p1261_p11 }
 0x25b   : > { %1271 = shalt.err (!%p1268_p7)
}
 0x25c   : > { %s1327_s12 = smov 128   ;;  %s1328_s20 = smov 8  }
 0x25d   : > { %1063 = dma.vmem_to_hbm [thread:$0]  (%p1518_p5), %s1607_s16, 512, %s1612_s19, %s665_s7, %s1327_s12, %s1327_s12, %s1328_s20  }
 0x25e PF: > { %s693_s25 = sand.u32 1, %s1306_s21   ;;  %p1680_p12 = scmp.ne.s32.totalorder %s1667_s28, 0 }
 0x25f   : > { %p1681_p1 = scmp.ge.s32.totalorder %s1318_s24, 2  ;;  %s694_s11 = scalar_lea.sflag [#allocation4], %s693_s25 }
 0x261   : > { %p1080_p2 = pnand %p1681_p1, %p1680_p12 }
 0x263   : > { %1301 = dma.done.wait (!%p1080_p2), %s694_s11, 512  }
 0x264   : > { %1303 = vsyncadd (!%p1080_p2), %s694_s11, 4294966784  ;;  %p21_p4 = scmp.ge.s32.totalorder %s1504_s18, 4   ;;  %s1682_s21 = smov %s1310_s22 }
 0x265   : > { %s1683_s22 = smov %s1314_s23  ;;  %s1684_s23 = smov %s1514_s14 }
 0x266   : > { %s1685_s24 = smov %s1504_s18  ;;  %23 = sbr.rel (!%p21_p4) target bundleno = 7 (0x7), region = 102 }
 0x26d   :  { %699 = vsyncpa [#allocation3], 1 }
 0x26e   :  { %701 = vsyncpa [#allocation3 + $0x1], 1 }
 0x26f   :  { %702 = vsyncpa [#allocation6], 1 }
 0x270   :  { %703 = vsyncpa [#allocation9], 1 }
 0x271   :  { %704 = vsyncpa [#allocation4], 1 }
 0x272   :  { %706 = vsyncpa [#allocation4 + $0x1], 1 }

</bundles_post_ra>
